<compile_context>
chip_gen: v5e
topology: v5e:2x2
jax: 0.10.0
libtpu: 0.0.40
codegen_flags: <defaults>
</compile_context>

<pallas_src>
import jax
import jax.numpy as jnp
from jax.experimental import pallas as pl
from jax.experimental.pallas import tpu as pltpu


# ----------------------------- kernel ---------------------------------------


def _make_atneuron_kernel(scale_lhs):
    """Build the kernel. `scale_lhs` (static Python bool) picks which operand
    carries the 1/t scale: (x/t + xv) @ y + x @ yv   vs   x @ (y/t + yv) + xv @ y.
    """

    def kernel(x_ref, y_ref, o_ref, xv_ref, yv_ref):
        # x_ref : (1, b_blk, N, K)   y_ref : (1, b_blk, K, M)
        # o_ref : (1, b_blk, N, M)
        # xv_ref: (b_blk, N, K) f32 scratch (persists across the time axis)
        # yv_ref: (b_blk, K, M) f32 scratch
        t = pl.program_id(1)          # timestep 0..T (inner, "arbitrary" axis)
        op_dtype = x_ref.dtype        # MXU operand dtype (bf16 stays bf16)

        @pl.when(t == 0)
        def _():
            # out[0] = 0 ; reset the temporal accumulators for this batch block.
            o_ref[...] = jnp.zeros(o_ref.shape, o_ref.dtype)
            xv_ref[...] = jnp.zeros(xv_ref.shape, xv_ref.dtype)
            yv_ref[...] = jnp.zeros(yv_ref.shape, yv_ref.dtype)

        @pl.when(t > 0)
        def _():
            inv_t = 1.0 / t.astype(jnp.float32)
            x_t = x_ref[0]                         # (b_blk, N, K)
            y_t = y_ref[0]                         # (b_blk, K, M)
            x32 = x_t.astype(jnp.float32)
            y32 = y_t.astype(jnp.float32)
            xv = xv_ref[...]
            yv = yv_ref[...]

            # Fused 2-dot form of  x@y/t + x@yv + xv@y  (f32 accumulation).
            if scale_lhs:
                lhs = (x32 * inv_t + xv).astype(op_dtype)
                out = jnp.einsum("bnk,bkm->bnm", lhs, y_t,
                                 preferred_element_type=jnp.float32)
                out = out + jnp.einsum("bnk,bkm->bnm", x_t, yv.astype(op_dtype),
                                       preferred_element_type=jnp.float32)
            else:
                rhs = (y32 * inv_t + yv).astype(op_dtype)
                out = jnp.einsum("bnk,bkm->bnm", x_t, rhs,
                                 preferred_element_type=jnp.float32)
                out = out + jnp.einsum("bnk,bkm->bnm", xv.astype(op_dtype), y_t,
                                       preferred_element_type=jnp.float32)

            o_ref[0] = out.astype(o_ref.dtype)
            xv_ref[...] = xv + x32 * inv_t
            yv_ref[...] = yv + y32 * inv_t

    return kernel


# --------------------------- sizing helpers ----------------------------------


def _padded_tile_bytes(shape2d_or_more, dtype):
    """VMEM footprint of a block: last dim rounded up to 128 lanes, second-to-
    last rounded to the sublane granule (8 * 32-bit packing factor)."""
    itemsize = jnp.dtype(dtype).itemsize
    packing = max(1, 4 // itemsize)
    *lead, s, l = shape2d_or_more
    s_pad = -(-s // (8 * packing)) * (8 * packing)
    l_pad = -(-l // 128) * 128
    n_lead = 1
    for d in lead:
        n_lead *= d
    return n_lead * s_pad * l_pad * itemsize


def _chip_vmem_limit_bytes():
    """Scoped-VMEM limit derived from the chip: ~75% of physical VMEM
    (~96 MiB on v5e/v6e's 128 MiB, ~48 MiB on v7x's 64 MiB per core)."""
    cap = 64 << 20  # conservative fallback (v7x per-TensorCore)
    try:
        info = pltpu.get_tpu_info()
        cap = int(getattr(info, "vmem_capacity_bytes", cap) or cap)
    except Exception:
        pass
    return (cap * 3) // 4


def _pick_b_blk(B, N, K, M, dtype, vmem_budget_bytes):
    """Largest batch block such that (a) it divides B, (b) the padded,
    double-buffered per-step blocks plus the f32 accumulator scratch fit the
    budget, and (c) the parallel batch axis has an even number (>=2) of grid
    steps when possible (megacore balance on v7x)."""
    io_per_batch = (_padded_tile_bytes((N, K), dtype)
                    + _padded_tile_bytes((K, M), dtype)
                    + _padded_tile_bytes((N, M), dtype))
    scratch_per_batch = (_padded_tile_bytes((N, K), jnp.float32)
                         + _padded_tile_bytes((K, M), jnp.float32))

    def fits(c):
        return 2 * c * io_per_batch + c * scratch_per_batch <= vmem_budget_bytes

    divisors = [c for c in range(1, B + 1) if B % c == 0]

    for want_even in (True, False):
        best = None
        for c in divisors:
            if not fits(c):
                continue
            steps = B // c
            if B >= 2 and steps < 2:
                continue
            if want_even and steps % 2 != 0:
                continue
            if best is None or c > best:
                best = c
        if best is not None:
            return best

    for c in sorted(divisors, reverse=True):   # last resort: drop balance prefs
        if fits(c):
            return c
    return 1


# ------------------------------ wrapper --------------------------------------


def at_neuron_forward(x, y, T, b_blk=None):
    """x: ((T+1)*B, N, K), y: ((T+1)*B, K, M) -> ((T+1)*B, N, M)."""
    TB, N, K = x.shape
    TB2, K2, M = y.shape
    assert TB == TB2 and K == K2 and TB % (T + 1) == 0
    B = TB // (T + 1)

    # ExpandTemporalDim(T + 1): free reshape, temporal-major layout.
    x4 = x.reshape(T + 1, B, N, K)
    y4 = y.reshape(T + 1, B, K, M)

    vmem_limit = _chip_vmem_limit_bytes()
    if b_blk is None:
        b_blk = _pick_b_blk(B, N, K, M, x.dtype,
                            vmem_budget_bytes=max(vmem_limit - (4 << 20), 1 << 20))
    assert B % b_blk == 0

    scale_lhs = N * K <= K * M   # put the 1/t scale on the smaller operand tile

    flops = 2 * B * T * 2 * N * K * M          # 2 fused matmuls per (batch, t>0)
    bytes_accessed = (x4.size + y4.size + (T + 1) * B * N * M) * jnp.dtype(x.dtype).itemsize

    out = pl.pallas_call(
        _make_atneuron_kernel(scale_lhs),
        out_shape=jax.ShapeDtypeStruct((T + 1, B, N, M), x.dtype),
        grid_spec=pltpu.PrefetchScalarGridSpec(
            num_scalar_prefetch=0,
            grid=(B // b_blk, T + 1),          # (parallel batch, sequential time)
            in_specs=[
                pl.BlockSpec((1, b_blk, N, K), lambda b, t: (t, b, 0, 0)),
                pl.BlockSpec((1, b_blk, K, M), lambda b, t: (t, b, 0, 0)),
            ],
            out_specs=pl.BlockSpec((1, b_blk, N, M), lambda b, t: (t, b, 0, 0)),
            scratch_shapes=[
                pltpu.VMEM((b_blk, N, K), jnp.float32),   # x_v accumulator
                pltpu.VMEM((b_blk, K, M), jnp.float32),   # y_v accumulator
            ],
        ),
        compiler_params=pltpu.CompilerParams(
            dimension_semantics=("parallel", "arbitrary"),
            vmem_limit_bytes=vmem_limit,
        ),
        cost_estimate=pl.CostEstimate(
            flops=flops, transcendentals=0, bytes_accessed=bytes_accessed
        ),
    )(x4, y4)

    # MergeTemporalDim
    return out.reshape((T + 1) * B, N, M)


# ----------------------------- reference -------------------------------------


def at_neuron_reference(x, y, T):
    """Pure-JAX transcription of the PyTorch 'm' / diff_rate branch."""
    TB, N, K = x.shape
    _, _, M = y.shape
    B = TB // (T + 1)
    xr = x.reshape(T + 1, B, N, K)
    yr = y.reshape(T + 1, B, K, M)
    bmm = lambda a, b: jnp.einsum("bnk,bkm->bnm", a, b)
    outs = [jnp.zeros((B, N, M), x.dtype)]
    xv = jnp.zeros_like(xr[0])
    yv = jnp.zeros_like(yr[0])
    for t in range(T):
        if t == 0:
            out = bmm(xr[1], yr[1])
            xv = xv + xr[1]
            yv = yv + yr[1]
        else:
            out = (
                bmm(xr[t + 1], yr[t + 1]) / (t + 1)
                + bmm(xr[t + 1], yv)
                + bmm(xv, yr[t + 1])
            )
            xv = xv + xr[t + 1] / (t + 1)
            yv = yv + yr[t + 1] / (t + 1)
        outs.append(out)
    return jnp.stack(outs, axis=0).reshape((T + 1) * B, N, M)


if __name__ == "__main__":
    T = 8      # module default
    B = 2
    # Lane-dense demo dims (contraction K and output minor M are 128) per the
    # perf review; the kernel remains correct for arbitrary dims.
    N, K, M = 16, 128, 128

    key = jax.random.PRNGKey(0)
    kx, ky = jax.random.split(key)
    x = jax.random.normal(kx, ((T + 1) * B, N, K), dtype=jnp.float32)
    y = jax.random.normal(ky, ((T + 1) * B, K, M), dtype=jnp.float32)

    out = jax.block_until_ready(at_neuron_forward(x, y, T))
    ref = jax.block_until_ready(at_neuron_reference(x, y, T))

    assert out.shape == ((T + 1) * B, N, M)
    err = jnp.max(jnp.abs(out - ref))
    assert jnp.allclose(out, ref, atol=2e-3, rtol=2e-3), f"mismatch vs reference (max abs err {err})"

    print("KERNEL_OK")
</pallas_src>

<mosaic_0001>
module attributes {stable_mosaic.version = 11 : i64} {
  func.func @kernel(%arg0: i32, %arg1: i32, %arg2: memref<1x1x16x128xf32, #tpu.memory_space<vmem>>, %arg3: memref<1x1x128x128xf32, #tpu.memory_space<vmem>>, %arg4: memref<1x1x16x128xf32, #tpu.memory_space<vmem>>, %arg5: memref<1x16x128xf32, #tpu.memory_space<vmem>>, %arg6: memref<1x128x128xf32, #tpu.memory_space<vmem>>) attributes {dimension_semantics = [#tpu.dimension_semantics<parallel>, #tpu.dimension_semantics<arbitrary>], iteration_bounds = array<i64: 2, 9>, scalar_prefetch = 0 : i64, scratch_operands = 2 : i64, tpu.core_type = #tpu.core_type<tc>, window_params = [{transform_indices = @transform_0, window_bounds = array<i64: 1, 1, 16, 128>}, {transform_indices = @transform_1, window_bounds = array<i64: 1, 1, 128, 128>}, {transform_indices = @transform_2, window_bounds = array<i64: 1, 1, 16, 128>}]} {
    %c0_i32 = arith.constant 0 : i32
    %0 = arith.cmpi eq, %arg1, %c0_i32 : i32
    %1 = arith.extui %0 : i1 to i32
    %c0_i32_0 = arith.constant 0 : i32
    %2 = arith.cmpi ne, %1, %c0_i32_0 : i32
    scf.if %2 {
      %cst = arith.constant 0.000000e+00 : f32
      %6 = vector.broadcast %cst : f32 to vector<1x1x16x128xf32>
      %c0 = arith.constant 0 : index
      %c0_3 = arith.constant 0 : index
      %c0_4 = arith.constant 0 : index
      %c0_5 = arith.constant 0 : index
      %7 = vector.load %arg4[%c0, %c0_3, %c0_4, %c0_5] : memref<1x1x16x128xf32, #tpu.memory_space<vmem>>, vector<1x1x16x128xf32>
      tpu.vector_store %arg4[%c0, %c0_3, %c0_4, %c0_5], %6 {strides = array<i32>} : memref<1x1x16x128xf32, #tpu.memory_space<vmem>>, vector<1x1x16x128xf32>,
      %cst_6 = arith.constant 0.000000e+00 : f32
      %8 = vector.broadcast %cst_6 : f32 to vector<1x16x128xf32>
      %c0_7 = arith.constant 0 : index
      %c0_8 = arith.constant 0 : index
      %c0_9 = arith.constant 0 : index
      %9 = vector.load %arg5[%c0_7, %c0_8, %c0_9] : memref<1x16x128xf32, #tpu.memory_space<vmem>>, vector<1x16x128xf32>
      tpu.vector_store %arg5[%c0_7, %c0_8, %c0_9], %8 {strides = array<i32>} : memref<1x16x128xf32, #tpu.memory_space<vmem>>, vector<1x16x128xf32>,
      %cst_10 = arith.constant 0.000000e+00 : f32
      %10 = vector.broadcast %cst_10 : f32 to vector<1x128x128xf32>
      %c0_11 = arith.constant 0 : index
      %c0_12 = arith.constant 0 : index
      %c0_13 = arith.constant 0 : index
      %11 = vector.load %arg6[%c0_11, %c0_12, %c0_13] : memref<1x128x128xf32, #tpu.memory_space<vmem>>, vector<1x128x128xf32>
      tpu.vector_store %arg6[%c0_11, %c0_12, %c0_13], %10 {strides = array<i32>} : memref<1x128x128xf32, #tpu.memory_space<vmem>>, vector<1x128x128xf32>,
    } else {
    }
    %c0_i32_1 = arith.constant 0 : i32
    %3 = arith.cmpi sgt, %arg1, %c0_i32_1 : i32
    %4 = arith.extui %3 : i1 to i32
    %c0_i32_2 = arith.constant 0 : i32
    %5 = arith.cmpi ne, %4, %c0_i32_2 : i32
    scf.if %5 {
      %6 = arith.sitofp %arg1 : i32 to f32
      %cst = arith.constant 1.000000e+00 : f32
      %7 = arith.divf %cst, %6 : f32
      %c0 = arith.constant 0 : index
      %c0_3 = arith.constant 0 : index
      %c0_4 = arith.constant 0 : index
      %c0_5 = arith.constant 0 : index
      %8 = vector.load %arg2[%c0, %c0_3, %c0_4, %c0_5] : memref<1x1x16x128xf32, #tpu.memory_space<vmem>>, vector<1x1x16x128xf32>
      %9 = vector.shape_cast %8 : vector<1x1x16x128xf32> to vector<1x16x128xf32>
      %c0_6 = arith.constant 0 : index
      %c0_7 = arith.constant 0 : index
      %c0_8 = arith.constant 0 : index
      %c0_9 = arith.constant 0 : index
      %10 = vector.load %arg3[%c0_6, %c0_7, %c0_8, %c0_9] : memref<1x1x128x128xf32, #tpu.memory_space<vmem>>, vector<1x1x128x128xf32>
      %11 = vector.shape_cast %10 : vector<1x1x128x128xf32> to vector<1x128x128xf32>
      %c0_10 = arith.constant 0 : index
      %c0_11 = arith.constant 0 : index
      %c0_12 = arith.constant 0 : index
      %12 = vector.load %arg5[%c0_10, %c0_11, %c0_12] : memref<1x16x128xf32, #tpu.memory_space<vmem>>, vector<1x16x128xf32>
      %c0_13 = arith.constant 0 : index
      %c0_14 = arith.constant 0 : index
      %c0_15 = arith.constant 0 : index
      %13 = vector.load %arg6[%c0_13, %c0_14, %c0_15] : memref<1x128x128xf32, #tpu.memory_space<vmem>>, vector<1x128x128xf32>
      %14 = vector.broadcast %7 : f32 to vector<1x16x128xf32>
      %15 = arith.mulf %9, %14 : vector<1x16x128xf32>
      %16 = arith.addf %15, %12 : vector<1x16x128xf32>
      "tpu.trace_start"() <{level = 10 : i32, message = "bnk,bkm->bnm"}> : () -> ()
      %cst_16 = arith.constant dense<0.000000e+00> : vector<1x16x128xf32>
      %17 = tpu.matmul %16, %11, %cst_16 {dimension_numbers = #tpu.dot_dimension_numbers<[2], [1], [1], [2], [0, 0, 0, 1, 1, 2], [0], [0]>} : vector<1x16x128xf32>, vector<1x128x128xf32>, vector<1x16x128xf32> -> vector<1x16x128xf32>
      %cst_17 = arith.constant dense<0.000000e+00> : vector<1x16x128xf32>
      %18 = tpu.matmul %9, %13, %cst_17 {dimension_numbers = #tpu.dot_dimension_numbers<[2], [1], [1], [2], [0, 0, 0, 1, 1, 2], [0], [0]>} : vector<1x16x128xf32>, vector<1x128x128xf32>, vector<1x16x128xf32> -> vector<1x16x128xf32>
      "tpu.trace_stop"() : () -> ()
      %19 = arith.addf %17, %18 : vector<1x16x128xf32>
      %c0_18 = arith.constant 0 : index
      %c0_19 = arith.constant 0 : index
      %c0_20 = arith.constant 0 : index
      %c0_21 = arith.constant 0 : index
      %20 = vector.load %arg4[%c0_18, %c0_19, %c0_20, %c0_21] : memref<1x1x16x128xf32, #tpu.memory_space<vmem>>, vector<1x1x16x128xf32>
      %21 = vector.shape_cast %20 : vector<1x1x16x128xf32> to vector<1x16x128xf32>
      %22 = vector.shape_cast %19 : vector<1x16x128xf32> to vector<1x1x16x128xf32>
      tpu.vector_store %arg4[%c0_18, %c0_19, %c0_20, %c0_21], %22 {strides = array<i32>} : memref<1x1x16x128xf32, #tpu.memory_space<vmem>>, vector<1x1x16x128xf32>,
      %23 = vector.broadcast %7 : f32 to vector<1x16x128xf32>
      %24 = arith.mulf %9, %23 : vector<1x16x128xf32>
      %25 = arith.addf %12, %24 : vector<1x16x128xf32>
      %c0_22 = arith.constant 0 : index
      %c0_23 = arith.constant 0 : index
      %c0_24 = arith.constant 0 : index
      %26 = vector.load %arg5[%c0_22, %c0_23, %c0_24] : memref<1x16x128xf32, #tpu.memory_space<vmem>>, vector<1x16x128xf32>
      tpu.vector_store %arg5[%c0_22, %c0_23, %c0_24], %25 {strides = array<i32>} : memref<1x16x128xf32, #tpu.memory_space<vmem>>, vector<1x16x128xf32>,
      %27 = vector.broadcast %7 : f32 to vector<1x128x128xf32>
      %28 = arith.mulf %11, %27 : vector<1x128x128xf32>
      %29 = arith.addf %13, %28 : vector<1x128x128xf32>
      %c0_25 = arith.constant 0 : index
      %c0_26 = arith.constant 0 : index
      %c0_27 = arith.constant 0 : index
      %30 = vector.load %arg6[%c0_25, %c0_26, %c0_27] : memref<1x128x128xf32, #tpu.memory_space<vmem>>, vector<1x128x128xf32>
      tpu.vector_store %arg6[%c0_25, %c0_26, %c0_27], %29 {strides = array<i32>} : memref<1x128x128xf32, #tpu.memory_space<vmem>>, vector<1x128x128xf32>,
    } else {
    }
    return
  }
  func.func @transform_0(%arg0: i32, %arg1: i32) -> (i32, i32, i32, i32) {
    %c0_i32 = arith.constant 0 : i32
    %c0_i32_0 = arith.constant 0 : i32
    %c0_i32_1 = arith.constant 0 : i32
    return %arg1, %arg0, %c0_i32, %c0_i32_0 : i32, i32, i32, i32
  }
  func.func @transform_1(%arg0: i32, %arg1: i32) -> (i32, i32, i32, i32) {
    %c0_i32 = arith.constant 0 : i32
    %c0_i32_0 = arith.constant 0 : i32
    %c0_i32_1 = arith.constant 0 : i32
    return %arg1, %arg0, %c0_i32, %c0_i32_0 : i32, i32, i32, i32
  }
  func.func @transform_2(%arg0: i32, %arg1: i32) -> (i32, i32, i32, i32) {
    %c0_i32 = arith.constant 0 : i32
    %c0_i32_0 = arith.constant 0 : i32
    %c0_i32_1 = arith.constant 0 : i32
    return %arg1, %arg0, %c0_i32, %c0_i32_0 : i32, i32, i32, i32
  }
}

</mosaic_0001>

<bundles_post_ra>
// kernel: tpu_custom_call.1
= control target key start
LH: loop header
LB: loop body
LE: loop exit
PB: predicated region body
PF: predicated region fallthrough
CT: control target
= control target key end

     0   :  { %s1193_s0 = inlined_call_operand.hbm [shape: f32[9,2,16,128], index: 0, kind: input, shape index: {}]   ;;  %s1194_s1 = inlined_call_operand.hbm [shape: f32[9,2,128,128], index: 1, kind: input, shape index: {}]   ;;  %s1195_s2 = inlined_call_operand.hbm [shape: f32[9,2,16,128], index: 2, kind: output, shape index: {}]  }
   0x1   :  { %1199 = sst [smem:[#allocation17_spill]] %s1193_s0 }
   0x2   :  { %7 = vsyncpa [#allocation5], 0 }
   0x3   :  { %9 = vsyncpa [#allocation5 + $0x1], 0 }
   0x4   :  { %10 = vsyncpa [#allocation8], 0 }
   0x5   :  { %12 = vsyncpa [#allocation8 + $0x1], 0 }
   0x6   :  { %13 = vsyncpa [#allocation6], 0 }
   0x7   :  { %15 = vsyncpa [#allocation6 + $0x1], 0  ;;  %s878_s9 = smov 0   ;;  %s880_s10 = smov 0  }
   0x8   :  { %s882_s11 = smov 0   ;;  %s884_s12 = smov 0  }
   0x9   :  { %s886_s13 = smov 0   ;;  %s888_s14 = smov 0  }
   0xa   :  { %s890_s15 = smov 0   ;;  %s892_s16 = smov 0  }
   0xb LB: > { %1200 = sst [smem:[#allocation13_spill]] %s836_s11  ;;  %s546_s17 = sadd.s32 4294967295, %s856_s16   ;;  %s856_s16 = sphi %s892_s16, %s21_s16   ;;  %s852_s15 = sphi %s890_s15, %s1221_s15   ;;  %s848_s14 = sphi %s888_s14, %s1220_s14   ;;  %s844_s13 = sphi %s886_s13, %s1219_s13   ;;  %s840_s12 = sphi %s884_s12, %s1218_s12   ;;  %s836_s11 = sphi %s882_s11, %s1213_s11   ;;  %s832_s10 = sphi %s880_s10, %s1217_s10   ;;  %s828_s9 = sphi %s878_s9, %s1216_s9  }
   0xc   : > { %s547_s18 = sadd.s32 4294967294, %s856_s16   ;;  %s30_s19 = sadd.s32 1, %s848_s14 }
   0xd   : > { %s33_s20 = sadd.s32 1, %s852_s15  ;;  %p31_p0 = scmp.ge.s32.totalorder %s30_s19, 9 }
   0xe   : > { %s42_s21 = sadd.s32 1, %s836_s11  ;;  %p49_p1 = scmp.ne.s32.totalorder %s836_s11, %s832_s10 }
   0xf   : > { %p50_p2 = scmp.eq.s32.totalorder %s856_s16, 0  ;;  %s1223_s19 = smov (%p31_p0, %s30_s19), 0 }
  0x10   : > { %1201 = sst [smem:[#allocation14_spill]] %s1223_s19  ;;  %s1225_s20 = smov (!%p31_p0, %s33_s20), %s852_s15 }
  0x11   : > { %s37_s22 = ssub.s32 %s848_s14, %s1223_s19  ;;  %p931_p3 = por %p50_p2, %p49_p1 }
  0x12   : > { %p35_p4 = scmp.ge.s32.totalorder %s1225_s20, 2  ;;  %p55_p5 = scmp.ne.s32.totalorder %s832_s10, %s828_s9 }
  0x13   : > { %p56_p6 = scmp.eq.s32.totalorder %s546_s17, 0  ;;  %p109_p7 = scmp.eq.s32.totalorder %s546_s17, 17 }
  0x14   : > { %s1227_s20 = smov (%p35_p4, %s1225_s20), 0  ;;  %p115_p10 = scmp.eq.s32.totalorder %s547_s18, 17 }
  0x15   : > { %1203 = sst [smem:[#allocation15_spill]] %s1227_s20  ;;  %p939_p8 = por %p56_p6, %p55_p5 }
  0x16   : > { %p943_p9 = por %p109_p7, %p49_p1  ;;  %s38_s26 = ssub.s32 %s852_s15, %s1227_s20 }
  0x17   : > { %s39_s27 = sor.u32 %s38_s26, %s37_s22  ;;  %p949_p12 = por %p115_p10, %p55_p5 }
  0x18   : > { %p40_p11 = scmp.eq.s32.totalorder %s39_s27, 0  ;;  %p621_p13 = scmp.lt.s32.totalorder %s856_s16, 18 }
  0x19   : > { %s955_s29 = sand.u32 1, %s836_s11   ;;  %s551_s4 = sshll.u32 %s852_s15, 1 }
  0x1a   : > { %s958_s30 = scalar_select %p40_p11, %s836_s11, %s42_s21  }
  0x1b   : > { %s550_s3 = sshll.u32 %s955_s29, 4  ;;  %s552_s5 = sshll.u32 %s848_s14, 2 }
  0x1c   : > { %1207 = sst [smem:[#allocation16_spill]] %s958_s30  ;;  %s139_s6 = scalar_lea.vmem [#allocation4], %s550_s3 }
  0x1d   : > { %s149_s7 = sshll.u32 %s139_s6, 4  ;;  %s144_s8 = sadd.s32 %s552_s5, %s551_s4  ;;  %s150_s7 = int_to_ptr.vmem [resolvable:$true] %s149_s7 }
  0x1e   : > { %s553_s17 = sshll.u32 %s144_s8, 3  ;;  %p965_p0 = pnand %p621_p13, %p931_p3 }
  0x1f   : > { %s1209_s0 = sld [smem:[#allocation17_spill]]  ;;  %s136_s20 = scalar_lea.sflag [#allocation5], %s955_s29 }
  0x20   : > { %s858_s3 = smov 128   ;;  %s859_s6 = smov 8  }
  0x21   : > { %p558_p1 = scmp.ge.s32.totalorder %s856_s16, 1  ;;  %p181_p2 = scmp.lt.s32.totalorder %s856_s16, 19 }
  0x22   : > { %s554_s23 = sshll.u32 %s955_s29, 7  ;;  %s555_s4 = sshll.u32 %s852_s15, 4 }
  0x23   : > { %p182_p3 = pnand %p558_p1, %p181_p2  ;;  %s556_s5 = sshll.u32 %s848_s14, 5 }
  0x24   : > { %s168_s8 = sadd.s32 %s556_s5, %s555_s4  ;;  %s163_s19 = scalar_lea.vmem [#allocation7], %s554_s23 }
  0x25   : > { %s146_s26 = scalar_lea.hbm %s1209_s0, %s553_s17  ;;  %s173_s21 = sshll.u32 %s163_s19, 4  ;;  %s174_s21 = int_to_ptr.vmem [resolvable:$true] %s173_s21 }
  0x26   : > { %s147_s27 = sshll.u32 %s146_s26, 4  ;;  %s557_s22 = sshll.u32 %s168_s8, 3  ;;  %s148_s27 = int_to_ptr.hbm [resolvable:$true] %s147_s27 }
  0x27   : > { %613 = dma.hbm_to_vmem [thread:$0]  (!%p965_p0), %s148_s27, 256, %s150_s7, %s136_s20, %s858_s3, %s858_s3, %s859_s6  }
  0x28   : > { %s170_s0 = scalar_lea.hbm %s1194_s1, %s557_s22  ;;  %s160_s11 = scalar_lea.sflag [#allocation8], %s955_s29 }
  0x29   : > { %s171_s30 = sshll.u32 %s170_s0, 4  ;;  %185 = sbr.rel (%p182_p3) target bundleno = 315 (0x13b), region = 28  ;;  %s172_s30 = int_to_ptr.hbm [resolvable:$true] %s171_s30 }
  0x2a   : > { %616 = dma.hbm_to_vmem [thread:$0]  (!%p965_p0), %s172_s30, 2048, %s174_s21, %s160_s11, %s858_s3, %s858_s3, %s859_s6  }
  0x2b   : > { %s987_s20 = sand.u32 (!%p182_p3), 1, %s832_s10  }
  0x2c   : > { %s559_s7 = sshll.u32 (!%p182_p3), %s987_s20, 4  ;;  %s188_s19 = scalar_lea.sflag (!%p182_p3), [#allocation5], %s987_s20 }
  0x2d   : > { %s991_s27 = scalar_lea.vmem (!%p182_p3), [#allocation4], %s559_s7 }
  0x2e   : > { %815 = dma.done.wait (%p939_p8), %s188_s19, 256  }
  0x2f   : > { %817 = vsyncadd (%p939_p8), %s188_s19, 4294967040  ;;  %s560_s0 = sshll.u32 %s987_s20, 7  ;;  %s198_s11 = scalar_lea.sflag [#allocation8], %s987_s20 }
  0x30   : > { %s999_s29 = scalar_lea.vmem [#allocation7], %s560_s0 }
  0x31   : > { %819 = dma.done.wait (%p939_p8), %s198_s11, 2048  }
  0x32   : > { %821 = vsyncadd (%p939_p8), %s198_s11, 4294965248  ;;  %s1005_s30 = scalar_lea.vmem [#allocation9], %s559_s7  ;;  %p562_p4 = scmp.ne.s32.totalorder %s840_s12, 0 }
  0x34   : > { %231 = sbr.rel (%p562_p4) target bundleno = 78 (0x4e), region = 40 }
  0x39   : > { %v860_v0 = vmov 0.0  }
  0x3a   : > { %232 = vst [vmem:[%s1005_s30] sm:$0xff] %v860_v0 }
  0x3b   : > { %233 = vst [vmem:[%s1005_s30 + $0x8] sm:$0xff] %v860_v0 }
  0x3c   : > { %234 = vst [vmem:[#allocation2] sm:$0xff] %v860_v0 }
  0x3d   : > { %235 = vst [vmem:[#allocation2 + $0x8] sm:$0xff] %v860_v0 }
  0x3e   : > { %236 = vst [vmem:[#allocation3 + $0x28] sm:$0xff] %v860_v0 }
  0x3f   : > { %237 = vst [vmem:[#allocation3 + $0x50] sm:$0xff] %v860_v0 }
  0x40   : > { %238 = vst [vmem:[#allocation3 + $0x10] sm:$0xff] %v860_v0 }
  0x41   : > { %239 = vst [vmem:[#allocation3 + $0x48] sm:$0xff] %v860_v0 }
  0x42   : > { %240 = vst [vmem:[#allocation3 + $0x60] sm:$0xff] %v860_v0 }
  0x43   : > { %241 = vst [vmem:[#allocation3] sm:$0xff] %v860_v0 }
  0x44   : > { %242 = vst [vmem:[#allocation3 + $0x40] sm:$0xff] %v860_v0 }
  0x45   : > { %243 = vst [vmem:[#allocation3 + $0x78] sm:$0xff] %v860_v0 }
  0x46   : > { %244 = vst [vmem:[#allocation3 + $0x18] sm:$0xff] %v860_v0 }
  0x47   : > { %245 = vst [vmem:[#allocation3 + $0x8] sm:$0xff] %v860_v0 }
  0x48   : > { %246 = vst [vmem:[#allocation3 + $0x30] sm:$0xff] %v860_v0 }
  0x49   : > { %247 = vst [vmem:[#allocation3 + $0x58] sm:$0xff] %v860_v0 }
  0x4a   : > { %248 = vst [vmem:[#allocation3 + $0x68] sm:$0xff] %v860_v0 }
  0x4b   : > { %249 = vst [vmem:[#allocation3 + $0x70] sm:$0xff] %v860_v0 }
  0x4c   : > { %250 = vst [vmem:[#allocation3 + $0x20] sm:$0xff] %v860_v0 }
  0x4d   : > { %251 = vst [vmem:[#allocation3 + $0x38] sm:$0xff] %v860_v0 }
  0x4e PF: > { %p563_p5 = scmp.le.s32.totalorder %s840_s12, 0 }
  0x4f   : > { %s256_s24 = scvt.s32.f32 (!%p563_p5), %s840_s12 }
  0x50   : > { %255 = sbr.rel (%p563_p5) target bundleno = 297 (0x129), region = 44 }
  0x55   : > { %v1012_v1 = vld [vmem:[#allocation3 + $0x38] sm:$0xff]  ;;  %v1017_v3 = vld [vmem:[#allocation3 + $0x20] sm:$0xff]  ;;  %v1022_v4 = vld [vmem:[%s999_s29 + $0x70] sm:$0xff]  ;;  %v257_v5 = vstv %s256_s24 }
  0x56   : > { %v1015_v2 = vld [vmem:[%s999_s29 + $0x78] sm:$0xff]  ;;  %314 = vmatpush.msra.mxu0 %v1012_v1  ;;  %570 = vmatpush.msra.mxu2 %v1012_v1  ;;  %v1026_v6 = vld [vmem:[#allocation3 + $0x70] sm:$0xff]  ;;  %692 = vrcp.f32 %v257_v5  ;;  %v1031_v7 = vld [vmem:[%s999_s29 + $0x68] sm:$0xff]  ;;  %v269_v17 = vand.u32 2147483648, %v257_v5  ;;  %vm263_vm0 = vweird.f32 %v257_v5  ;;  %v267_v20 = vand.u32 2147483647, %v257_v5 }
  0x57   : > { %337 = vmatpush.msra.mxu1 %v1015_v2  ;;  %586 = vmatpush.msra.mxu3 %v1015_v2  ;;  %v1035_v8 = vld [vmem:[#allocation3 + $0x68] sm:$0xff]  ;;  %v1040_v9 = vld [vmem:[%s999_s29 + $0x60] sm:$0xff]  ;;  %v1044_v10 = vld [vmem:[#allocation3 + $0x58] sm:$0xff] }
  0x58   : > { %315 = vmatpush.msra.mxu0 %v1017_v3  ;;  %571 = vmatpush.msra.mxu2 %v1017_v3  ;;  %v1049_v11 = vld [vmem:[%s999_s29 + $0x58] sm:$0xff]  ;;  %v1053_v12 = vld [vmem:[#allocation3 + $0x30] sm:$0xff]  ;;  %v1062_v16 = vld [vmem:[#allocation3 + $0x8] sm:$0xff]  ;;  %v270_v26 = vor.u32 1.1754944e-38, %v269_v17  ;;  %vm268_vm3 = vcmp.eq.f32.partialorder %v267_v20, 8.507059e+37 }
  0x59   : > { %338 = vmatpush.msra.mxu1 %v1022_v4  ;;  %587 = vmatpush.msra.mxu3 %v1022_v4  ;;  %v1058_v14 = vld [vmem:[%s999_s29 + $0x50] sm:$0xff]  ;;  %v1067_v18 = vld [vmem:[%s999_s29 + $0x48] sm:$0xff]  ;;  %v1071_v21 = vld [vmem:[#allocation3 + $0x18] sm:$0xff] }
  0x5a   : > { %316 = vmatpush.msra.mxu0 %v1026_v6  ;;  %572 = vmatpush.msra.mxu2 %v1026_v6  ;;  %v1076_v22 = vld [vmem:[%s999_s29 + $0x40] sm:$0xff]  ;;  %v1080_v24 = vld [vmem:[#allocation3 + $0x78] sm:$0xff]  ;;  %v281_v30 = vld [vmem:[%s999_s29 + $0x30] sm:$0xff] }
  0x5b   : > { %339 = vmatpush.msra.mxu1 %v1031_v7  ;;  %588 = vmatpush.msra.mxu3 %v1031_v7  ;;  %v1089_v27 = vld [vmem:[%s999_s29 + $0x38] sm:$0xff]  ;;  %v1093_v29 = vld [vmem:[#allocation3 + $0x40] sm:$0xff]  ;;  %v280_v34 = vld [vmem:[%s999_s29 + $0x28] sm:$0xff] }
  0x5c   : > { %317 = vmatpush.msra.mxu0 %v1035_v8  ;;  %573 = vmatpush.msra.mxu2 %v1035_v8  ;;  %v693_v13 = vpop.eup %692  ;;  %v298_v32 = vld [vmem:[#allocation3] sm:$0xff]  ;;  %v296_v37 = vld [vmem:[#allocation3 + $0x48] sm:$0xff]  ;;  %v278_v38 = vld [vmem:[%s999_s29 + $0x18] sm:$0xff] }
  0x5d   : > { %340 = vmatpush.msra.mxu1 %v1040_v9  ;;  %589 = vmatpush.msra.mxu3 %v1040_v9  ;;  %v259_v15 = vmul.f32 %v693_v13, %v257_v5  ;;  %vm264_vm1 = vweird.f32 %v693_v13  ;;  %v297_v35 = vld [vmem:[#allocation3 + $0x60] sm:$0xff]  ;;  %v1107_v39 = vld [vmem:[#allocation3 + $0x10] sm:$0xff]  ;;  %v276_v41 = vld [vmem:[%s999_s29 + $0x8] sm:$0xff] }
  0x5e   : > { %318 = vmatpush.msra.mxu0 %v1044_v10  ;;  %574 = vmatpush.msra.mxu2 %v1044_v10  ;;  %vm1082_vm2 = vmor %vm263_vm0, %vm264_vm1  ;;  %v279_v36 = vld [vmem:[%s999_s29 + $0x20] sm:$0xff]  ;;  %v277_v40 = vld [vmem:[%s999_s29 + $0x10] sm:$0xff] }
  0x5f   : > { %341 = vmatpush.msra.mxu1 %v1049_v11  ;;  %590 = vmatpush.msra.mxu3 %v1049_v11  ;;  %v260_v19 = vsub.f32 1.0, %v259_v15  ;;  %v1113_v42 = vld [vmem:[#allocation3 + $0x50] sm:$0xff]  ;;  %v1117_v43 = vld [vmem:[#allocation3 + $0x28] sm:$0xff]  ;;  %v275_v44 = vld [vmem:[%s999_s29] sm:$0xff] }
  0x60   : > { %319 = vmatpush.msra.mxu0 %v1053_v12  ;;  %575 = vmatpush.msra.mxu2 %v1053_v12  ;;  %v273_v45 = vld [vmem:[%s991_s27] sm:$0xff]  ;;  %v274_v46 = vld [vmem:[%s991_s27 + $0x8] sm:$0xff] }
  0x61   : > { %342 = vmatpush.msra.mxu1 %v1058_v14  ;;  %591 = vmatpush.msra.mxu3 %v1058_v14  ;;  %v261_v23 = vmul.f32 %v693_v13, %v260_v19  ;;  %v291_v0 = vld [vmem:[#allocation2] sm:$0xff]  ;;  %v292_v5 = vld [vmem:[#allocation2 + $0x8] sm:$0xff] }
  0x62   : > { %320 = vmatpush.msra.mxu0 %v1062_v16  ;;  %576 = vmatpush.msra.mxu2 %v1062_v16 }
  0x63   : > { %343 = vmatpush.msra.mxu1 %v1067_v18  ;;  %592 = vmatpush.msra.mxu3 %v1067_v18  ;;  %v262_v28 = vadd.f32 %v693_v13, %v261_v23 }
  0x64   : > { %321 = vmatpush.msra.mxu0 %v1071_v21  ;;  %577 = vmatpush.msra.mxu2 %v1071_v21 }
  0x65   : > { %344 = vmatpush.msra.mxu1 %v1076_v22  ;;  %593 = vmatpush.msra.mxu3 %v1076_v22  ;;  %v266_v31 = vsel %vm1082_vm2, %v693_v13, %v262_v28 }
  0x66   : > { %322 = vmatpush.msra.mxu0 %v1080_v24  ;;  %578 = vmatpush.msra.mxu2 %v1080_v24  ;;  %v271_v33 = vsel %vm268_vm3, %v270_v26, %v266_v31 }
  0x67   : > { %345 = vmatpush.msra.mxu1 %v1089_v27  ;;  %594 = vmatpush.msra.mxu3 %v1089_v27  ;;  %602 = vpush %v271_v33 }
  0x68   : > { %323 = vmatpush.msra.mxu0 %v1093_v29  ;;  %579 = vmatpush.msra.mxu2 %v1093_v29 }
  0x69   : > { %346 = vmatpush.msra.mxu1 %v281_v30  ;;  %595 = vmatpush.msra.mxu3 %v281_v30 }
  0x6a   : > { %324 = vmatpush.msra.mxu0 %v298_v32  ;;  %580 = vmatpush.msra.mxu2 %v298_v32 }
  0x6b   : > { %347 = vmatpush.msra.mxu1 %v280_v34  ;;  %596 = vmatpush.msra.mxu3 %v280_v34 }
  0x6c   : > { %325 = vmatpush.msra.mxu0 %v297_v35  ;;  %581 = vmatpush.msra.mxu2 %v297_v35 }
  0x6d   : > { %348 = vmatpush.msra.mxu1 %v279_v36  ;;  %597 = vmatpush.msra.mxu3 %v279_v36 }
  0x6e   : > { %326 = vmatpush.msra.mxu0 %v296_v37  ;;  %582 = vmatpush.msra.mxu2 %v296_v37 }
  0x6f   : > { %349 = vmatpush.msra.mxu1 %v278_v38  ;;  %598 = vmatpush.msra.mxu3 %v278_v38 }
  0x70   : > { %327 = vmatpush.msra.mxu0 %v1107_v39  ;;  %583 = vmatpush.msra.mxu2 %v1107_v39 }
  0x71   : > { %350 = vmatpush.msra.mxu1 %v277_v40  ;;  %599 = vmatpush.msra.mxu3 %v277_v40 }
  0x72   : > { %328 = vmatpush.msra.mxu0 %v1113_v42  ;;  %584 = vmatpush.msra.mxu2 %v1113_v42 }
  0x73   : > { %351 = vmatpush.msra.mxu1 %v276_v41  ;;  %600 = vmatpush.msra.mxu3 %v276_v41 }
  0x74   : > { %329 = vmatpush.msra.mxu0 %v1117_v43  ;;  %585 = vmatpush.msra.mxu2 %v1117_v43 }
  0x75   : > { %352 = vmatpush.msra.mxu1 %v275_v44  ;;  %601 = vmatpush.msra.mxu3 %v275_v44 }
  0x76   : > { %330 = vmatmul.f32.vlgmr.msra.gmra.mxu0 %v273_v45  ;;  %333 = vmatmul.f32.vlgmr.msra.gmra.mxu2 %v274_v46 }
  0x98   : > { %s603_s18 = spop %602 }
  0x99   : > { %v309_v47 = vstv %s603_s18 }
  0x9a   : > { %v367_v48 = vmul.f32 %v309_v47, %v278_v38  ;;  %v368_v49 = vmul.f32 %v309_v47, %v279_v36  ;;  %v369_v50 = vmul.f32 %v309_v47, %v280_v34  ;;  %v370_v51 = vmul.f32 %v309_v47, %v281_v30 }
  0x9b   : > { %v371_v52 = vmul.f32 %v309_v47, %v1089_v27  ;;  %v372_v53 = vmul.f32 %v309_v47, %v1076_v22  ;;  %v373_v54 = vmul.f32 %v309_v47, %v1067_v18  ;;  %v374_v58 = vmul.f32 %v309_v47, %v1058_v14 }
  0x9c   : > { %v383_v55 = vadd.f32 %v367_v48, %v296_v37  ;;  %v384_v56 = vadd.f32 %v368_v49, %v297_v35  ;;  %v385_v57 = vadd.f32 %v369_v50, %v298_v32  ;;  %v386_v59 = vadd.f32 %v370_v51, %v1093_v29 }
  0x9d   : > { %v375_v60 = vmul.f32 %v309_v47, %v1049_v11  ;;  %v387_v61 = vadd.f32 %v371_v52, %v1080_v24  ;;  %v376_v62 = vmul.f32 %v309_v47, %v1040_v9  ;;  %v388_v63 = vadd.f32 %v372_v53, %v1071_v21 }
  0x9e   : > { %399 = vst [vmem:[#allocation3 + $0x48] sm:$0xff] %v383_v55  ;;  %v377_v13 = vmul.f32 %v309_v47, %v1031_v7  ;;  %v389_v15 = vadd.f32 %v373_v54, %v1062_v16  ;;  %v310_v14 = vmul.f32 %v309_v47, %v273_v45  ;;  %v311_v17 = vmul.f32 %v309_v47, %v274_v46 }
  0x9f   : > { %400 = vst [vmem:[#allocation3 + $0x60] sm:$0xff] %v384_v56  ;;  %v378_v18 = vmul.f32 %v309_v47, %v1022_v4  ;;  %v390_v11 = vadd.f32 %v374_v58, %v1053_v12  ;;  %v379_v19 = vmul.f32 %v309_v47, %v1015_v2  ;;  %v391_v9 = vadd.f32 %v375_v60, %v1044_v10 }
  0xa0   : > { %401 = vst [vmem:[#allocation3] sm:$0xff] %v385_v57  ;;  %v312_v20 = vadd.f32 %v310_v14, %v291_v0  ;;  %v313_v21 = vadd.f32 %v311_v17, %v292_v5  ;;  %v392_v22 = vadd.f32 %v376_v62, %v1035_v8  ;;  %v366_v7 = vmul.f32 %v309_v47, %v277_v40 }
  0xa1   : > { %402 = vst [vmem:[#allocation3 + $0x40] sm:$0xff] %v386_v59  ;;  %v393_v16 = vadd.f32 %v377_v13, %v1026_v6  ;;  %v365_v23 = vmul.f32 %v309_v47, %v276_v41  ;;  %v394_v4 = vadd.f32 %v378_v18, %v1017_v3  ;;  %v364_v12 = vmul.f32 %v309_v47, %v275_v44 }
  0xa2   : > { %403 = vst [vmem:[#allocation3 + $0x78] sm:$0xff] %v387_v61  ;;  %353 = vmatmul.f32.vlgmr.msra.gmra.mxu1 %v312_v20  ;;  %356 = vmatmul.f32.vlgmr.msra.gmra.mxu3 %v313_v21  ;;  %v395_v2 = vadd.f32 %v379_v19, %v1012_v1  ;;  %v382_v10 = vadd.f32 %v366_v7, %v1107_v39 }
  0xa3   : > { %404 = vst [vmem:[#allocation3 + $0x18] sm:$0xff] %v388_v63  ;;  %v381_v8 = vadd.f32 %v365_v23, %v1113_v42  ;;  %v380_v6 = vadd.f32 %v364_v12, %v1117_v43 }
  0xa4   : > { %405 = vst [vmem:[#allocation3 + $0x8] sm:$0xff] %v389_v15 }
  0xa5   : > { %406 = vst [vmem:[#allocation3 + $0x30] sm:$0xff] %v390_v11 }
  0xa6   : > { %407 = vst [vmem:[#allocation3 + $0x58] sm:$0xff] %v391_v9 }
  0xa7   : > { %408 = vst [vmem:[#allocation3 + $0x68] sm:$0xff] %v392_v22 }
  0xa8   : > { %409 = vst [vmem:[#allocation3 + $0x70] sm:$0xff] %v393_v16 }
  0xa9   : > { %410 = vst [vmem:[#allocation3 + $0x20] sm:$0xff] %v394_v4 }
  0xaa   : > { %411 = vst [vmem:[#allocation3 + $0x38] sm:$0xff] %v395_v2 }
  0xab   : > { %398 = vst [vmem:[#allocation3 + $0x10] sm:$0xff] %v382_v10 }
  0xac   : > { %397 = vst [vmem:[#allocation3 + $0x50] sm:$0xff] %v381_v8 }
  0xad   : > { %396 = vst [vmem:[#allocation3 + $0x28] sm:$0xff] %v380_v6 }
  0xae   : > { %362 = vst [vmem:[#allocation2] sm:$0xff] %v312_v20 }
  0xaf   : > { %363 = vst [vmem:[#allocation2 + $0x8] sm:$0xff] %v313_v21 }
  0xf3   : > { %v331_v3 = vpop.f32.mrf.mxu0 }
  0xf9   : > { %v334_v25 = vpop.f32.mrf.mxu2 }
 0x11f   : > { %v354_v1 = vpop.f32.mrf.mxu1 }
 0x120   : > { %v355_v24 = vadd.f32 %v354_v1, %v331_v3 }
 0x122   : > { %360 = vst [vmem:[%s1005_s30] sm:$0xff] %v355_v24 }
 0x125   : > { %v357_v26 = vpop.f32.mrf.mxu3 }
 0x126   : > { %v358_v27 = vadd.f32 %v357_v26, %v334_v25 }
 0x128   : > { %361 = vst [vmem:[%s1005_s30 + $0x8] sm:$0xff] %v358_v27 }
 0x129 PF: > { %s565_s3 = sshll.u32 %s844_s13, 1  ;;  %s566_s6 = sshll.u32 %s840_s12, 2 }
 0x12a   : > { %s427_s23 = sshll.u32 %s1005_s30, 4  ;;  %s424_s4 = sadd.s32 %s566_s6, %s565_s3  ;;  %s428_s23 = int_to_ptr.vmem [resolvable:$true] %s427_s23 }
 0x12b   : > { %s567_s5 = sshll.u32 %s424_s4, 3  ;;  %s413_s26 = scalar_lea.sflag [#allocation6], %s987_s20 }
 0x12c   : > { %s426_s22 = scalar_lea.hbm %s1195_s2, %s567_s5  ;;  %s774_s27 = scalar_lea.hbm %s1195_s2, 288 }
 0x12d   : > { %s429_s17 = sshll.u32 %s426_s22, 4  ;;  %s430_s17 = int_to_ptr.hbm [resolvable:$true] %s429_s17 }
 0x12e   : > { %s768_s7 = sshra.s32 %s430_s17, 4  ;;  %s769_s7 = int_to_ptr.hbm [resolvable:$true] %s768_s7 }
 0x12f   : > { %s770_s19 = scalar_lea.hbm %s769_s7, 16  ;;  %p775_p10 = scmp.lt.s32.totalorder %s769_s7, %s1195_s2 }
 0x130   : > { %p771_p6 = scmp.ne.s32.totalorder %s769_s7, %s770_s19  ;;  %p776_p11 = scmp.lt.s32.totalorder %s774_s27, %s770_s19 }
 0x132   : > { %p772_p7 = pnand %p771_p6, %p943_p9  ;;  %p777_p13 = por %p776_p11, %p775_p10 }
 0x134   : > { %p773_p8 = pneg %p772_p7 }
 0x136   : > { %p778_p0 = pnand %p777_p13, %p773_p8 }
 0x138   : > { %781 = shalt.err (!%p778_p0)
}
 0x139   : > { %s861_s20 = smov 128   ;;  %s862_s29 = smov 8  }
 0x13a   : > { %608 = dma.vmem_to_hbm [thread:$0]  (%p943_p9), %s428_s23, 256, %s430_s17, %s413_s26, %s861_s20, %s861_s20, %s862_s29  }
 0x13b PF: > { %p622_p1 = scmp.ge.s32.totalorder %s856_s16, 2  ;;  %s444_s30 = sand.u32 1, %s828_s9  }
 0x13c   : > { %s445_s24 = scalar_lea.sflag [#allocation6], %s444_s30 }
 0x13d   : > { %p618_p2 = pnand %p622_p1, %p949_p12 }
 0x13f   : > { %p619_p3 = pneg %p618_p2 }
 0x141   : > { %823 = dma.done.wait (%p619_p3), %s445_s24, 256  }
 0x142   : > { %825 = vsyncadd (%p619_p3), %s445_s24, 4294967040  ;;  %s21_s16 = sadd.s32 1, %s856_s16   ;;  %s1212_s18 = sld [smem:[#allocation13_spill]] }
 0x143   : > { %p18_p4 = scmp.ge.s32.totalorder %s21_s16, 20   ;;  %s1213_s11 = sld [smem:[#allocation16_spill]] }
 0x144   : > { %s1214_s25 = sld [smem:[#allocation14_spill]]  ;;  %s1216_s9 = smov %s832_s10 }
 0x145   : > { %s1215_s3 = sld [smem:[#allocation15_spill]]  ;;  %s1218_s12 = smov %s848_s14 }
 0x146   : > { %s1219_s13 = smov %s852_s15 }
 0x147   :  { %20 = sbr.rel (!%p18_p4) target bundleno = 11 (0xb), region = 94 }
 0x148   : > { %s1217_s10 = smov %s1212_s18 }
 0x14a   : > { %s1220_s14 = smov %s1214_s25 }
 0x14b   : > { %s1221_s15 = smov %s1215_s3 }
 0x14c   :  { %451 = vsyncpa [#allocation5], 1 }
 0x14d   :  { %453 = vsyncpa [#allocation5 + $0x1], 1 }
 0x14e   :  { %454 = vsyncpa [#allocation8], 1 }
 0x14f   :  { %456 = vsyncpa [#allocation8 + $0x1], 1 }
 0x150   :  { %457 = vsyncpa [#allocation6], 1 }
 0x151   :  { %459 = vsyncpa [#allocation6 + $0x1], 1 }

</bundles_post_ra>
